<compile_context>
chip_gen: v7x
topology: tpu7x:2x2x1
jax: 0.10.0
libtpu: 0.0.40
codegen_flags: <defaults>
</compile_context>

<pallas_src>
import functools

import jax
import jax.numpy as jnp
from jax import lax
from jax.experimental import pallas as pl
from jax.experimental.pallas import tpu as pltpu

_LANE = 128   # TPU lane width (last dim)
_SUB = 8      # TPU sublane granularity (second-to-last dim)


def _ceil_to(x, m):
    return ((x + m - 1) // m) * m


def _lif_kernel_factory(t_blk, tau_m, threshold, v_rest, dt):
    inv_tau = 1.0 / tau_m

    def kernel(x_ref, v0_ref, out_ref, v_ref):
        # x_ref/out_ref: (t_blk, s_blk, 128); v0_ref/v_ref: (s_blk, 128).
        # Time chunks are the innermost grid axis, so each neuron block sees
        # its chunks consecutively; the scratch carries the membrane
        # potential across chunks and is re-initialised at the first chunk.
        @pl.when(pl.program_id(1) == 0)
        def _():
            v_ref[...] = v0_ref[...]

        def body(t, v):
            inp = x_ref[t]                                   # (s_blk, 128)
            if dt != 1.0:
                inp = inp * dt
            # Same arithmetic form as the PyTorch / reference update.
            v = v + (v_rest - v) * inv_tau + inp
            m = v >= threshold                               # single compare
            out_ref[t] = m.astype(out_ref.dtype)             # spike output
            return jnp.where(m, v_rest, v)                   # reset to rest

        # Membrane potential stays in registers across the time loop:
        # one scratch load before, one scratch store after.
        # NOTE: in the (unpadded) partial last time chunk the extra loop
        # iterations read undefined VMEM; they only affect v_final, which is
        # re-initialised at the next neuron block and never returned.
        v_final = lax.fori_loop(0, t_blk, body, v_ref[...],
                                unroll=min(8, t_blk))
        v_ref[...] = v_final

    return kernel


@functools.partial(jax.jit, static_argnames=(
    "tau_m", "threshold", "v_rest", "dt", "block_neurons", "block_t"))
def lif_forward(weighted_input, membrane_potential, *,
                tau_m=20.0, threshold=-50.0, v_rest=-65.0, dt=1.0,
                block_neurons=1024, block_t=512):
    """weighted_input: (T, N); membrane_potential: (N,) initial state.

    Returns spikes of shape (T, N) float32 (matches the PyTorch forward).
    """
    # TODO(synk): the PyTorch module persists self.membrane_potential across
    # forward() calls; returning the final state would require masking the
    # partial last time chunk. Only the forward() return value (spikes) is
    # produced here.
    T, N = weighted_input.shape
    x = weighted_input.astype(jnp.float32)
    v0 = membrane_potential.astype(jnp.float32)

    # Neuron axis: pad to a lane multiple only when needed (zero-copy in the
    # common aligned case). Padded neurons' outputs are sliced off below.
    n_pad = _ceil_to(N, _LANE)
    if n_pad != N:
        x = jnp.pad(x, ((0, 0), (0, n_pad - N)))
        v0 = jnp.pad(v0, (0, n_pad - N), constant_values=float(v_rest))
    s_total = n_pad // _LANE

    # Sublane-dense neuron block: a multiple of 8 (or the full dim when
    # small). The last neuron block may be partial.
    if s_total <= _SUB:
        s_blk = s_total
    else:
        s_blk = max(_SUB, min(block_neurons // _LANE, s_total))
        s_blk = (s_blk // _SUB) * _SUB
    n_blocks = pl.cdiv(s_total, s_blk)

    # Time axis: chunked with no padding; the last chunk may be partial.
    t_blk = min(block_t, T)
    n_tchunks = pl.cdiv(T, t_blk)

    x3 = x.reshape(T, s_total, _LANE)        # free reshape (splits last dim)
    v0_2 = v0.reshape(s_total, _LANE)

    kernel = _lif_kernel_factory(t_blk, float(tau_m), float(threshold),
                                 float(v_rest), float(dt))

    # Default 2 MiB blocks -> ~8 MiB pipelined (in+out double-buffered),
    # inside every generation's scoped-VMEM default. Cap the requested limit
    # at 48 MiB so larger user-chosen blocks still fit v7x's 64 MiB VMEM.
    block_bytes = t_blk * s_blk * _LANE * 4
    vmem_limit = max(16 << 20, min(48 << 20, 4 * block_bytes + (2 << 20)))

    cost = pl.CostEstimate(
        flops=6 * T * n_pad,
        transcendentals=0,
        bytes_accessed=8 * T * n_pad + 4 * n_pad)

    spikes3 = pl.pallas_call(
        kernel,
        out_shape=jax.ShapeDtypeStruct((T, s_total, _LANE), jnp.float32),
        grid_spec=pltpu.PrefetchScalarGridSpec(
            num_scalar_prefetch=0,
            grid=(n_blocks, n_tchunks),        # neuron blocks outer, time inner
            in_specs=[
                pl.BlockSpec((t_blk, s_blk, _LANE), lambda j, tc: (tc, j, 0)),
                pl.BlockSpec((s_blk, _LANE), lambda j, tc: (j, 0)),
            ],
            out_specs=pl.BlockSpec((t_blk, s_blk, _LANE),
                                   lambda j, tc: (tc, j, 0)),
            scratch_shapes=[pltpu.VMEM((s_blk, _LANE), jnp.float32)],
        ),
        compiler_params=pltpu.CompilerParams(
            dimension_semantics=("parallel", "arbitrary"),
            vmem_limit_bytes=vmem_limit),
        cost_estimate=cost,
    )(x3, v0_2)

    spikes = spikes3.reshape(T, n_pad)
    if n_pad != N:
        spikes = spikes[:, :N]
    return spikes


def lif_reference(weighted_input, membrane_potential, *,
                  tau_m=20.0, threshold=-50.0, v_rest=-65.0, dt=1.0):
    """Pure-JAX reference mirroring the PyTorch forward (same arithmetic
    form as the kernel so the comparison is exact)."""
    inv_tau = 1.0 / tau_m
    x = weighted_input.astype(jnp.float32)
    v = membrane_potential.astype(jnp.float32)
    outs = []
    for t in range(x.shape[0]):
        v = v + (v_rest - v) * inv_tau + x[t] * dt
        s = (v >= threshold).astype(jnp.float32)
        outs.append(s)
        v = jnp.where(s > 0, jnp.full_like(v, v_rest), v)
    return jnp.stack(outs, axis=0)


if __name__ == "__main__":
    tau_m, threshold, v_rest, dt = 20.0, -50.0, -65.0, 1.0
    key = jax.random.PRNGKey(0)
    k1, k2 = jax.random.split(key)

    # --- Case 1: module-sized problem (T=8, num_neurons=128) ---------------
    T1, N1 = 8, 128
    # register_buffer('membrane_potential', full((num_neurons,), v_rest))
    mp1 = jnp.full((N1,), v_rest, dtype=jnp.float32)
    x1 = 10.0 * jax.random.normal(k1, (T1, N1), dtype=jnp.float32)

    out1 = jax.block_until_ready(
        lif_forward(x1, mp1, tau_m=tau_m, threshold=threshold,
                    v_rest=v_rest, dt=dt))
    ref1 = lif_reference(x1, mp1, tau_m=tau_m, threshold=threshold,
                         v_rest=v_rest, dt=dt)
    assert out1.shape == (T1, N1)
    assert jnp.array_equal(out1, ref1), "case 1: Pallas kernel mismatch"

    # --- Case 2: exercises neuron padding (1200 -> 1280 lanes), a partial
    # last neuron block (s_total=10, s_blk=8) and a partial last time chunk
    # (T=12 with t_blk=8 -> chunks of 8 and 4) ------------------------------
    T2, N2 = 12, 1200
    mp2 = jnp.full((N2,), v_rest, dtype=jnp.float32)
    x2 = 10.0 * jax.random.normal(k2, (T2, N2), dtype=jnp.float32)

    out2 = jax.block_until_ready(
        lif_forward(x2, mp2, tau_m=tau_m, threshold=threshold,
                    v_rest=v_rest, dt=dt, block_neurons=1024, block_t=8))
    ref2 = lif_reference(x2, mp2, tau_m=tau_m, threshold=threshold,
                         v_rest=v_rest, dt=dt)
    assert out2.shape == (T2, N2)
    assert jnp.array_equal(out2, ref2), "case 2: Pallas kernel mismatch"

    print("KERNEL_OK")
</pallas_src>

<mosaic_0001>
module attributes {stable_mosaic.version = 11 : i64} {
  func.func @kernel(%arg0: i32, %arg1: i32, %arg2: memref<8x1x128xf32, #tpu.memory_space<vmem>>, %arg3: memref<1x128xf32, #tpu.memory_space<vmem>>, %arg4: memref<8x1x128xf32, #tpu.memory_space<vmem>>, %arg5: memref<1x128xf32, #tpu.memory_space<vmem>>) attributes {dimension_semantics = [#tpu.dimension_semantics<parallel>, #tpu.dimension_semantics<arbitrary>], iteration_bounds = array<i64: 1, 1>, scalar_prefetch = 0 : i64, scratch_operands = 1 : i64, tpu.core_type = #tpu.core_type<tc>, window_params = [{transform_indices = @transform_0, window_bounds = array<i64: 8, 1, 128>}, {transform_indices = @transform_1, window_bounds = array<i64: 1, 128>}, {transform_indices = @transform_2, window_bounds = array<i64: 8, 1, 128>}]} {
    %c0_i32 = arith.constant 0 : i32
    %0 = arith.cmpi eq, %arg1, %c0_i32 : i32
    %1 = arith.extui %0 : i1 to i32
    %c0_i32_0 = arith.constant 0 : i32
    %2 = arith.cmpi ne, %1, %c0_i32_0 : i32
    scf.if %2 {
      %c0_68 = arith.constant 0 : index
      %c0_69 = arith.constant 0 : index
      %157 = vector.load %arg3[%c0_68, %c0_69] : memref<1x128xf32, #tpu.memory_space<vmem>>, vector<1x128xf32>
      %c0_70 = arith.constant 0 : index
      %c0_71 = arith.constant 0 : index
      %158 = vector.load %arg5[%c0_70, %c0_71] : memref<1x128xf32, #tpu.memory_space<vmem>>, vector<1x128xf32>
      tpu.vector_store %arg5[%c0_70, %c0_71], %157 {strides = array<i32>} : memref<1x128xf32, #tpu.memory_space<vmem>>, vector<1x128xf32>,
    } else {
    }
    %c0 = arith.constant 0 : index
    %c0_1 = arith.constant 0 : index
    %3 = vector.load %arg5[%c0, %c0_1] : memref<1x128xf32, #tpu.memory_space<vmem>>, vector<1x128xf32>
    %c0_i32_2 = arith.constant 0 : i32
    %4 = arith.index_cast %c0_i32_2 : i32 to index
    %c0_3 = arith.constant 0 : index
    %c0_4 = arith.constant 0 : index
    %5 = vector.load %arg2[%4, %c0_3, %c0_4] : memref<8x1x128xf32, #tpu.memory_space<vmem>>, vector<1x1x128xf32>
    %6 = vector.shape_cast %5 : vector<1x1x128xf32> to vector<1x128xf32>
    %cst = arith.constant -6.500000e+01 : f32
    %7 = vector.broadcast %cst : f32 to vector<1x128xf32>
    %8 = arith.subf %7, %3 : vector<1x128xf32>
    %cst_5 = arith.constant 5.000000e-02 : f32
    %9 = vector.broadcast %cst_5 : f32 to vector<1x128xf32>
    %10 = arith.mulf %8, %9 : vector<1x128xf32>
    %11 = arith.addf %3, %10 : vector<1x128xf32>
    %12 = arith.addf %11, %6 : vector<1x128xf32>
    %cst_6 = arith.constant -5.000000e+01 : f32
    %13 = vector.broadcast %cst_6 : f32 to vector<1x128xf32>
    %14 = arith.cmpf oge, %12, %13 : vector<1x128xf32>
    %15 = arith.extui %14 : vector<1x128xi1> to vector<1x128xi32>
    %16 = arith.sitofp %15 : vector<1x128xi32> to vector<1x128xf32>
    %17 = arith.index_cast %c0_i32_2 : i32 to index
    %c0_7 = arith.constant 0 : index
    %c0_8 = arith.constant 0 : index
    %18 = vector.load %arg4[%17, %c0_7, %c0_8] : memref<8x1x128xf32, #tpu.memory_space<vmem>>, vector<1x1x128xf32>
    %19 = vector.shape_cast %18 : vector<1x1x128xf32> to vector<1x128xf32>
    %20 = vector.shape_cast %16 : vector<1x128xf32> to vector<1x1x128xf32>
    tpu.vector_store %arg4[%17, %c0_7, %c0_8], %20 {strides = array<i32>} : memref<8x1x128xf32, #tpu.memory_space<vmem>>, vector<1x1x128xf32>,
    %cst_9 = arith.constant -6.500000e+01 : f32
    %21 = vector.broadcast %cst_9 : f32 to vector<1x128xf32>
    %22 = arith.select %14, %21, %12 : vector<1x128xi1>, vector<1x128xf32>
    %c1_i32 = arith.constant 1 : i32
    %23 = arith.index_cast %c1_i32 : i32 to index
    %c0_10 = arith.constant 0 : index
    %c0_11 = arith.constant 0 : index
    %24 = vector.load %arg2[%23, %c0_10, %c0_11] : memref<8x1x128xf32, #tpu.memory_space<vmem>>, vector<1x1x128xf32>
    %25 = vector.shape_cast %24 : vector<1x1x128xf32> to vector<1x128xf32>
    %cst_12 = arith.constant -6.500000e+01 : f32
    %26 = vector.broadcast %cst_12 : f32 to vector<1x128xf32>
    %27 = arith.subf %26, %22 : vector<1x128xf32>
    %cst_13 = arith.constant 5.000000e-02 : f32
    %28 = vector.broadcast %cst_13 : f32 to vector<1x128xf32>
    %29 = arith.mulf %27, %28 : vector<1x128xf32>
    %30 = arith.addf %22, %29 : vector<1x128xf32>
    %31 = arith.addf %30, %25 : vector<1x128xf32>
    %cst_14 = arith.constant -5.000000e+01 : f32
    %32 = vector.broadcast %cst_14 : f32 to vector<1x128xf32>
    %33 = arith.cmpf oge, %31, %32 : vector<1x128xf32>
    %34 = arith.extui %33 : vector<1x128xi1> to vector<1x128xi32>
    %35 = arith.sitofp %34 : vector<1x128xi32> to vector<1x128xf32>
    %36 = arith.index_cast %c1_i32 : i32 to index
    %c0_15 = arith.constant 0 : index
    %c0_16 = arith.constant 0 : index
    %37 = vector.load %arg4[%36, %c0_15, %c0_16] : memref<8x1x128xf32, #tpu.memory_space<vmem>>, vector<1x1x128xf32>
    %38 = vector.shape_cast %37 : vector<1x1x128xf32> to vector<1x128xf32>
    %39 = vector.shape_cast %35 : vector<1x128xf32> to vector<1x1x128xf32>
    tpu.vector_store %arg4[%36, %c0_15, %c0_16], %39 {strides = array<i32>} : memref<8x1x128xf32, #tpu.memory_space<vmem>>, vector<1x1x128xf32>,
    %cst_17 = arith.constant -6.500000e+01 : f32
    %40 = vector.broadcast %cst_17 : f32 to vector<1x128xf32>
    %41 = arith.select %33, %40, %31 : vector<1x128xi1>, vector<1x128xf32>
    %c2_i32 = arith.constant 2 : i32
    %42 = arith.index_cast %c2_i32 : i32 to index
    %c0_18 = arith.constant 0 : index
    %c0_19 = arith.constant 0 : index
    %43 = vector.load %arg2[%42, %c0_18, %c0_19] : memref<8x1x128xf32, #tpu.memory_space<vmem>>, vector<1x1x128xf32>
    %44 = vector.shape_cast %43 : vector<1x1x128xf32> to vector<1x128xf32>
    %cst_20 = arith.constant -6.500000e+01 : f32
    %45 = vector.broadcast %cst_20 : f32 to vector<1x128xf32>
    %46 = arith.subf %45, %41 : vector<1x128xf32>
    %cst_21 = arith.constant 5.000000e-02 : f32
    %47 = vector.broadcast %cst_21 : f32 to vector<1x128xf32>
    %48 = arith.mulf %46, %47 : vector<1x128xf32>
    %49 = arith.addf %41, %48 : vector<1x128xf32>
    %50 = arith.addf %49, %44 : vector<1x128xf32>
    %cst_22 = arith.constant -5.000000e+01 : f32
    %51 = vector.broadcast %cst_22 : f32 to vector<1x128xf32>
    %52 = arith.cmpf oge, %50, %51 : vector<1x128xf32>
    %53 = arith.extui %52 : vector<1x128xi1> to vector<1x128xi32>
    %54 = arith.sitofp %53 : vector<1x128xi32> to vector<1x128xf32>
    %55 = arith.index_cast %c2_i32 : i32 to index
    %c0_23 = arith.constant 0 : index
    %c0_24 = arith.constant 0 : index
    %56 = vector.load %arg4[%55, %c0_23, %c0_24] : memref<8x1x128xf32, #tpu.memory_space<vmem>>, vector<1x1x128xf32>
    %57 = vector.shape_cast %56 : vector<1x1x128xf32> to vector<1x128xf32>
    %58 = vector.shape_cast %54 : vector<1x128xf32> to vector<1x1x128xf32>
    tpu.vector_store %arg4[%55, %c0_23, %c0_24], %58 {strides = array<i32>} : memref<8x1x128xf32, #tpu.memory_space<vmem>>, vector<1x1x128xf32>,
    %cst_25 = arith.constant -6.500000e+01 : f32
    %59 = vector.broadcast %cst_25 : f32 to vector<1x128xf32>
    %60 = arith.select %52, %59, %50 : vector<1x128xi1>, vector<1x128xf32>
    %c3_i32 = arith.constant 3 : i32
    %61 = arith.index_cast %c3_i32 : i32 to index
    %c0_26 = arith.constant 0 : index
    %c0_27 = arith.constant 0 : index
    %62 = vector.load %arg2[%61, %c0_26, %c0_27] : memref<8x1x128xf32, #tpu.memory_space<vmem>>, vector<1x1x128xf32>
    %63 = vector.shape_cast %62 : vector<1x1x128xf32> to vector<1x128xf32>
    %cst_28 = arith.constant -6.500000e+01 : f32
    %64 = vector.broadcast %cst_28 : f32 to vector<1x128xf32>
    %65 = arith.subf %64, %60 : vector<1x128xf32>
    %cst_29 = arith.constant 5.000000e-02 : f32
    %66 = vector.broadcast %cst_29 : f32 to vector<1x128xf32>
    %67 = arith.mulf %65, %66 : vector<1x128xf32>
    %68 = arith.addf %60, %67 : vector<1x128xf32>
    %69 = arith.addf %68, %63 : vector<1x128xf32>
    %cst_30 = arith.constant -5.000000e+01 : f32
    %70 = vector.broadcast %cst_30 : f32 to vector<1x128xf32>
    %71 = arith.cmpf oge, %69, %70 : vector<1x128xf32>
    %72 = arith.extui %71 : vector<1x128xi1> to vector<1x128xi32>
    %73 = arith.sitofp %72 : vector<1x128xi32> to vector<1x128xf32>
    %74 = arith.index_cast %c3_i32 : i32 to index
    %c0_31 = arith.constant 0 : index
    %c0_32 = arith.constant 0 : index
    %75 = vector.load %arg4[%74, %c0_31, %c0_32] : memref<8x1x128xf32, #tpu.memory_space<vmem>>, vector<1x1x128xf32>
    %76 = vector.shape_cast %75 : vector<1x1x128xf32> to vector<1x128xf32>
    %77 = vector.shape_cast %73 : vector<1x128xf32> to vector<1x1x128xf32>
    tpu.vector_store %arg4[%74, %c0_31, %c0_32], %77 {strides = array<i32>} : memref<8x1x128xf32, #tpu.memory_space<vmem>>, vector<1x1x128xf32>,
    %cst_33 = arith.constant -6.500000e+01 : f32
    %78 = vector.broadcast %cst_33 : f32 to vector<1x128xf32>
    %79 = arith.select %71, %78, %69 : vector<1x128xi1>, vector<1x128xf32>
    %c4_i32 = arith.constant 4 : i32
    %80 = arith.index_cast %c4_i32 : i32 to index
    %c0_34 = arith.constant 0 : index
    %c0_35 = arith.constant 0 : index
    %81 = vector.load %arg2[%80, %c0_34, %c0_35] : memref<8x1x128xf32, #tpu.memory_space<vmem>>, vector<1x1x128xf32>
    %82 = vector.shape_cast %81 : vector<1x1x128xf32> to vector<1x128xf32>
    %cst_36 = arith.constant -6.500000e+01 : f32
    %83 = vector.broadcast %cst_36 : f32 to vector<1x128xf32>
    %84 = arith.subf %83, %79 : vector<1x128xf32>
    %cst_37 = arith.constant 5.000000e-02 : f32
    %85 = vector.broadcast %cst_37 : f32 to vector<1x128xf32>
    %86 = arith.mulf %84, %85 : vector<1x128xf32>
    %87 = arith.addf %79, %86 : vector<1x128xf32>
    %88 = arith.addf %87, %82 : vector<1x128xf32>
    %cst_38 = arith.constant -5.000000e+01 : f32
    %89 = vector.broadcast %cst_38 : f32 to vector<1x128xf32>
    %90 = arith.cmpf oge, %88, %89 : vector<1x128xf32>
    %91 = arith.extui %90 : vector<1x128xi1> to vector<1x128xi32>
    %92 = arith.sitofp %91 : vector<1x128xi32> to vector<1x128xf32>
    %93 = arith.index_cast %c4_i32 : i32 to index
    %c0_39 = arith.constant 0 : index
    %c0_40 = arith.constant 0 : index
    %94 = vector.load %arg4[%93, %c0_39, %c0_40] : memref<8x1x128xf32, #tpu.memory_space<vmem>>, vector<1x1x128xf32>
    %95 = vector.shape_cast %94 : vector<1x1x128xf32> to vector<1x128xf32>
    %96 = vector.shape_cast %92 : vector<1x128xf32> to vector<1x1x128xf32>
    tpu.vector_store %arg4[%93, %c0_39, %c0_40], %96 {strides = array<i32>} : memref<8x1x128xf32, #tpu.memory_space<vmem>>, vector<1x1x128xf32>,
    %cst_41 = arith.constant -6.500000e+01 : f32
    %97 = vector.broadcast %cst_41 : f32 to vector<1x128xf32>
    %98 = arith.select %90, %97, %88 : vector<1x128xi1>, vector<1x128xf32>
    %c5_i32 = arith.constant 5 : i32
    %99 = arith.index_cast %c5_i32 : i32 to index
    %c0_42 = arith.constant 0 : index
    %c0_43 = arith.constant 0 : index
    %100 = vector.load %arg2[%99, %c0_42, %c0_43] : memref<8x1x128xf32, #tpu.memory_space<vmem>>, vector<1x1x128xf32>
    %101 = vector.shape_cast %100 : vector<1x1x128xf32> to vector<1x128xf32>
    %cst_44 = arith.constant -6.500000e+01 : f32
    %102 = vector.broadcast %cst_44 : f32 to vector<1x128xf32>
    %103 = arith.subf %102, %98 : vector<1x128xf32>
    %cst_45 = arith.constant 5.000000e-02 : f32
    %104 = vector.broadcast %cst_45 : f32 to vector<1x128xf32>
    %105 = arith.mulf %103, %104 : vector<1x128xf32>
    %106 = arith.addf %98, %105 : vector<1x128xf32>
    %107 = arith.addf %106, %101 : vector<1x128xf32>
    %cst_46 = arith.constant -5.000000e+01 : f32
    %108 = vector.broadcast %cst_46 : f32 to vector<1x128xf32>
    %109 = arith.cmpf oge, %107, %108 : vector<1x128xf32>
    %110 = arith.extui %109 : vector<1x128xi1> to vector<1x128xi32>
    %111 = arith.sitofp %110 : vector<1x128xi32> to vector<1x128xf32>
    %112 = arith.index_cast %c5_i32 : i32 to index
    %c0_47 = arith.constant 0 : index
    %c0_48 = arith.constant 0 : index
    %113 = vector.load %arg4[%112, %c0_47, %c0_48] : memref<8x1x128xf32, #tpu.memory_space<vmem>>, vector<1x1x128xf32>
    %114 = vector.shape_cast %113 : vector<1x1x128xf32> to vector<1x128xf32>
    %115 = vector.shape_cast %111 : vector<1x128xf32> to vector<1x1x128xf32>
    tpu.vector_store %arg4[%112, %c0_47, %c0_48], %115 {strides = array<i32>} : memref<8x1x128xf32, #tpu.memory_space<vmem>>, vector<1x1x128xf32>,
    %cst_49 = arith.constant -6.500000e+01 : f32
    %116 = vector.broadcast %cst_49 : f32 to vector<1x128xf32>
    %117 = arith.select %109, %116, %107 : vector<1x128xi1>, vector<1x128xf32>
    %c6_i32 = arith.constant 6 : i32
    %118 = arith.index_cast %c6_i32 : i32 to index
    %c0_50 = arith.constant 0 : index
    %c0_51 = arith.constant 0 : index
    %119 = vector.load %arg2[%118, %c0_50, %c0_51] : memref<8x1x128xf32, #tpu.memory_space<vmem>>, vector<1x1x128xf32>
    %120 = vector.shape_cast %119 : vector<1x1x128xf32> to vector<1x128xf32>
    %cst_52 = arith.constant -6.500000e+01 : f32
    %121 = vector.broadcast %cst_52 : f32 to vector<1x128xf32>
    %122 = arith.subf %121, %117 : vector<1x128xf32>
    %cst_53 = arith.constant 5.000000e-02 : f32
    %123 = vector.broadcast %cst_53 : f32 to vector<1x128xf32>
    %124 = arith.mulf %122, %123 : vector<1x128xf32>
    %125 = arith.addf %117, %124 : vector<1x128xf32>
    %126 = arith.addf %125, %120 : vector<1x128xf32>
    %cst_54 = arith.constant -5.000000e+01 : f32
    %127 = vector.broadcast %cst_54 : f32 to vector<1x128xf32>
    %128 = arith.cmpf oge, %126, %127 : vector<1x128xf32>
    %129 = arith.extui %128 : vector<1x128xi1> to vector<1x128xi32>
    %130 = arith.sitofp %129 : vector<1x128xi32> to vector<1x128xf32>
    %131 = arith.index_cast %c6_i32 : i32 to index
    %c0_55 = arith.constant 0 : index
    %c0_56 = arith.constant 0 : index
    %132 = vector.load %arg4[%131, %c0_55, %c0_56] : memref<8x1x128xf32, #tpu.memory_space<vmem>>, vector<1x1x128xf32>
    %133 = vector.shape_cast %132 : vector<1x1x128xf32> to vector<1x128xf32>
    %134 = vector.shape_cast %130 : vector<1x128xf32> to vector<1x1x128xf32>
    tpu.vector_store %arg4[%131, %c0_55, %c0_56], %134 {strides = array<i32>} : memref<8x1x128xf32, #tpu.memory_space<vmem>>, vector<1x1x128xf32>,
    %cst_57 = arith.constant -6.500000e+01 : f32
    %135 = vector.broadcast %cst_57 : f32 to vector<1x128xf32>
    %136 = arith.select %128, %135, %126 : vector<1x128xi1>, vector<1x128xf32>
    %c7_i32 = arith.constant 7 : i32
    %137 = arith.index_cast %c7_i32 : i32 to index
    %c0_58 = arith.constant 0 : index
    %c0_59 = arith.constant 0 : index
    %138 = vector.load %arg2[%137, %c0_58, %c0_59] : memref<8x1x128xf32, #tpu.memory_space<vmem>>, vector<1x1x128xf32>
    %139 = vector.shape_cast %138 : vector<1x1x128xf32> to vector<1x128xf32>
    %cst_60 = arith.constant -6.500000e+01 : f32
    %140 = vector.broadcast %cst_60 : f32 to vector<1x128xf32>
    %141 = arith.subf %140, %136 : vector<1x128xf32>
    %cst_61 = arith.constant 5.000000e-02 : f32
    %142 = vector.broadcast %cst_61 : f32 to vector<1x128xf32>
    %143 = arith.mulf %141, %142 : vector<1x128xf32>
    %144 = arith.addf %136, %143 : vector<1x128xf32>
    %145 = arith.addf %144, %139 : vector<1x128xf32>
    %cst_62 = arith.constant -5.000000e+01 : f32
    %146 = vector.broadcast %cst_62 : f32 to vector<1x128xf32>
    %147 = arith.cmpf oge, %145, %146 : vector<1x128xf32>
    %148 = arith.extui %147 : vector<1x128xi1> to vector<1x128xi32>
    %149 = arith.sitofp %148 : vector<1x128xi32> to vector<1x128xf32>
    %150 = arith.index_cast %c7_i32 : i32 to index
    %c0_63 = arith.constant 0 : index
    %c0_64 = arith.constant 0 : index
    %151 = vector.load %arg4[%150, %c0_63, %c0_64] : memref<8x1x128xf32, #tpu.memory_space<vmem>>, vector<1x1x128xf32>
    %152 = vector.shape_cast %151 : vector<1x1x128xf32> to vector<1x128xf32>
    %153 = vector.shape_cast %149 : vector<1x128xf32> to vector<1x1x128xf32>
    tpu.vector_store %arg4[%150, %c0_63, %c0_64], %153 {strides = array<i32>} : memref<8x1x128xf32, #tpu.memory_space<vmem>>, vector<1x1x128xf32>,
    %cst_65 = arith.constant -6.500000e+01 : f32
    %154 = vector.broadcast %cst_65 : f32 to vector<1x128xf32>
    %155 = arith.select %147, %154, %145 : vector<1x128xi1>, vector<1x128xf32>
    %c8_i32 = arith.constant 8 : i32
    %c0_66 = arith.constant 0 : index
    %c0_67 = arith.constant 0 : index
    %156 = vector.load %arg5[%c0_66, %c0_67] : memref<1x128xf32, #tpu.memory_space<vmem>>, vector<1x128xf32>
    tpu.vector_store %arg5[%c0_66, %c0_67], %155 {strides = array<i32>} : memref<1x128xf32, #tpu.memory_space<vmem>>, vector<1x128xf32>,
    return
  }
  func.func @transform_0(%arg0: i32, %arg1: i32) -> (i32, i32, i32) {
    %c0_i32 = arith.constant 0 : i32
    %c0_i32_0 = arith.constant 0 : i32
    return %arg1, %arg0, %c0_i32 : i32, i32, i32
  }
  func.func @transform_1(%arg0: i32, %arg1: i32) -> (i32, i32) {
    %c0_i32 = arith.constant 0 : i32
    %c0_i32_0 = arith.constant 0 : i32
    return %arg0, %c0_i32 : i32, i32
  }
  func.func @transform_2(%arg0: i32, %arg1: i32) -> (i32, i32, i32) {
    %c0_i32 = arith.constant 0 : i32
    %c0_i32_0 = arith.constant 0 : i32
    return %arg1, %arg0, %c0_i32 : i32, i32, i32
  }
}

</mosaic_0001>

<bundles_post_ra>
// kernel: lif_forward.1
= control target key start
LH: loop header
LB: loop body
LE: loop exit
PB: predicated region body
PF: predicated region fallthrough
CT: control target
= control target key end

     0   :  { %7 = vsyncpa [#allocation4], 0  ;;  %s267_s0 = inlined_call_operand.hbm [shape: f32[8,1,128], index: 0, kind: input, shape index: {}]   ;;  %s268_s1 = inlined_call_operand.vmem [shape: f32[1,128], index: 1, kind: input, shape index: {}]   ;;  %s269_s2 = inlined_call_operand.hbm [shape: f32[8,1,128], index: 2, kind: output, shape index: {}]  }
   0x1   :  { %8 = vsyncpa [#allocation5], 0  ;;  %s206_s9 = smov [#allocation3]   ;;  %s158_s13 = scalar_lea.hbm %s267_s0, 128 }
   0x2   :  { %s14_s10 = sshll.u32 %s206_s9, 4  ;;  %p159_p0 = scmp.ne.s32.totalorder %s267_s0, %s158_s13  ;;  %s15_s10 = int_to_ptr.vmem [resolvable:$true] %s14_s10 }
   0x3   :  { %p162_p1 = scmp.lt.u32.totalorder %s158_s13, %s267_s0 }
   0x5   :  { %p164_p2 = pnand %p162_p1, %p159_p0 }
   0x7   :  { %167 = shalt.err (!%p164_p2)
}
   0x8   :  { %s168_s18 = scalar_lea.vmem %s15_s10, 128  ;;  %p173_p4 = scmp.lt.s32.totalorder %s15_s10, %s15_s10 }
   0x9   :  { %p169_p3 = scmp.ne.s32.totalorder %s15_s10, %s168_s18  ;;  %p174_p5 = scmp.lt.s32.totalorder %s168_s18, %s168_s18 }
   0xb   :  { %p175_p6 = por %p174_p5, %p173_p4 }
   0xd   :  { %p176_p7 = pnand %p175_p6, %p169_p3 }
   0xf   :  { %179 = shalt.err (!%p176_p7)
}
  0x10   :  { %s207_s19 = smov 16   ;;  %s208_s20 = smov 1  }
  0x11   :  { %20 = dma.hbm_to_vmem [thread:$0]  %s267_s0, 128, %s15_s10, [#allocation4], %s207_s19, %s207_s19, %s208_s20  }
  0x12   :  { %202 = dma.done.wait [#allocation4], 128  }
  0x13   :  { %203 = vsyncadd [#allocation4], 4294967168  ;;  %v30_v0 = vld [vmem:[%s268_s1] sm:$0x1]  ;;  %v33_v4 = vld [vmem:[#allocation3] sm:$0x1] }
  0x14   :  { %31 = vst [vmem:[#allocation2] sm:$0x1] %v30_v0  ;;  %v209_v7 = vmov 0.0   ;;  %v44_v12 = vld [vmem:[#allocation3 + $0x1] sm:$0x1]  ;;  %s210_s0 = smov [#allocation6]  }
  0x15   :  { %v56_v19 = vld [vmem:[#allocation3 + $0x2] sm:$0x1]  ;;  %v68_v26 = vld [vmem:[#allocation3 + $0x3] sm:$0x1]  ;;  %v80_v33 = vld [vmem:[#allocation3 + $0x4] sm:$0x1] }
  0x16   :  { %v92_v40 = vld [vmem:[#allocation3 + $0x5] sm:$0x1]  ;;  %v104_v47 = vld [vmem:[#allocation3 + $0x6] sm:$0x1]  ;;  %v116_v54 = vld [vmem:[#allocation3 + $0x7] sm:$0x1] }
  0x17   :  { %s133_s1 = sshll.u32 %s210_s0, 4  ;;  %s134_s1 = int_to_ptr.vmem [resolvable:$true] %s133_s1 }
  0x18   :  { %s180_s25 = scalar_lea.vmem %s134_s1, 128  ;;  %p185_p9 = scmp.lt.s32.totalorder %s134_s1, %s134_s1 }
  0x19   :  { %p181_p8 = scmp.ne.s32.totalorder %s134_s1, %s180_s25  ;;  %p186_p10 = scmp.lt.s32.totalorder %s180_s25, %s180_s25 }
  0x1b   :  { %v32_v1 = vld [vmem:[#allocation2] sm:$0x1]  ;;  %p187_p11 = por %p186_p10, %p185_p9 }
  0x1c   :  { %v34_v2 = vsub.f32 -65.0, %v32_v1 }
  0x1d   :  { %p188_p12 = pnand %p187_p11, %p181_p8 }
  0x1e   :  { %v35_v3 = vmul.f32 0.05, %v34_v2 }
  0x20   :  { %v36_v5 = vadd.f32 %v35_v3, %v32_v1 }
  0x22   :  { %v37_v6 = vadd.f32 %v36_v5, %v33_v4 }
  0x24   :  { %vm38_vm0 = vcmp.ge.f32.partialorder %v37_v6, -50.0 }
  0x25   :  { %v145_v8 = vsel %vm38_vm0, 1.0, %v209_v7  ;;  %v42_v9 = vsel %vm38_vm0, -65.0, %v37_v6 }
  0x26   :  { %41 = vst [vmem:[#allocation6] sm:$0x1] %v145_v8  ;;  %v45_v10 = vsub.f32 -65.0, %v42_v9 }
  0x28   :  { %v46_v11 = vmul.f32 0.05, %v45_v10 }
  0x2a   :  { %v47_v13 = vadd.f32 %v46_v11, %v42_v9 }
  0x2c   :  { %v48_v14 = vadd.f32 %v47_v13, %v44_v12 }
  0x2e   :  { %vm49_vm1 = vcmp.ge.f32.partialorder %v48_v14, -50.0 }
  0x2f   :  { %v146_v15 = vsel %vm49_vm1, 1.0, %v209_v7  ;;  %v54_v16 = vsel %vm49_vm1, -65.0, %v48_v14 }
  0x30   :  { %53 = vst [vmem:[#allocation6 + $0x1] sm:$0x1] %v146_v15  ;;  %v57_v17 = vsub.f32 -65.0, %v54_v16 }
  0x32   :  { %v58_v18 = vmul.f32 0.05, %v57_v17 }
  0x34   :  { %v59_v20 = vadd.f32 %v58_v18, %v54_v16 }
  0x36   :  { %v60_v21 = vadd.f32 %v59_v20, %v56_v19 }
  0x38   :  { %vm61_vm2 = vcmp.ge.f32.partialorder %v60_v21, -50.0 }
  0x39   :  { %v147_v22 = vsel %vm61_vm2, 1.0, %v209_v7  ;;  %v66_v23 = vsel %vm61_vm2, -65.0, %v60_v21 }
  0x3a   :  { %65 = vst [vmem:[#allocation6 + $0x2] sm:$0x1] %v147_v22  ;;  %v69_v24 = vsub.f32 -65.0, %v66_v23 }
  0x3c   :  { %v70_v25 = vmul.f32 0.05, %v69_v24 }
  0x3e   :  { %v71_v27 = vadd.f32 %v70_v25, %v66_v23 }
  0x40   :  { %v72_v28 = vadd.f32 %v71_v27, %v68_v26 }
  0x42   :  { %vm73_vm3 = vcmp.ge.f32.partialorder %v72_v28, -50.0 }
  0x43   :  { %v148_v29 = vsel %vm73_vm3, 1.0, %v209_v7  ;;  %v78_v30 = vsel %vm73_vm3, -65.0, %v72_v28 }
  0x44   :  { %77 = vst [vmem:[#allocation6 + $0x3] sm:$0x1] %v148_v29  ;;  %v81_v31 = vsub.f32 -65.0, %v78_v30 }
  0x46   :  { %v82_v32 = vmul.f32 0.05, %v81_v31 }
  0x48   :  { %v83_v34 = vadd.f32 %v82_v32, %v78_v30 }
  0x4a   :  { %v84_v35 = vadd.f32 %v83_v34, %v80_v33 }
  0x4c   :  { %vm85_vm4 = vcmp.ge.f32.partialorder %v84_v35, -50.0 }
  0x4d   :  { %v149_v36 = vsel %vm85_vm4, 1.0, %v209_v7  ;;  %v90_v37 = vsel %vm85_vm4, -65.0, %v84_v35 }
  0x4e   :  { %89 = vst [vmem:[#allocation6 + $0x4] sm:$0x1] %v149_v36  ;;  %v93_v38 = vsub.f32 -65.0, %v90_v37 }
  0x50   :  { %v94_v39 = vmul.f32 0.05, %v93_v38 }
  0x52   :  { %v95_v41 = vadd.f32 %v94_v39, %v90_v37 }
  0x54   :  { %v96_v42 = vadd.f32 %v95_v41, %v92_v40 }
  0x56   :  { %vm97_vm5 = vcmp.ge.f32.partialorder %v96_v42, -50.0 }
  0x57   :  { %v150_v43 = vsel %vm97_vm5, 1.0, %v209_v7  ;;  %v102_v44 = vsel %vm97_vm5, -65.0, %v96_v42 }
  0x58   :  { %101 = vst [vmem:[#allocation6 + $0x5] sm:$0x1] %v150_v43  ;;  %v105_v45 = vsub.f32 -65.0, %v102_v44 }
  0x5a   :  { %v106_v46 = vmul.f32 0.05, %v105_v45 }
  0x5c   :  { %v107_v48 = vadd.f32 %v106_v46, %v102_v44 }
  0x5e   :  { %v108_v49 = vadd.f32 %v107_v48, %v104_v47 }
  0x60   :  { %vm109_vm6 = vcmp.ge.f32.partialorder %v108_v49, -50.0 }
  0x61   :  { %v151_v50 = vsel %vm109_vm6, 1.0, %v209_v7  ;;  %v114_v51 = vsel %vm109_vm6, -65.0, %v108_v49 }
  0x62   :  { %113 = vst [vmem:[#allocation6 + $0x6] sm:$0x1] %v151_v50  ;;  %v117_v52 = vsub.f32 -65.0, %v114_v51 }
  0x64   :  { %v118_v53 = vmul.f32 0.05, %v117_v52 }
  0x66   :  { %v119_v55 = vadd.f32 %v118_v53, %v114_v51 }
  0x68   :  { %v120_v56 = vadd.f32 %v119_v55, %v116_v54 }
  0x6a   :  { %vm121_vm7 = vcmp.ge.f32.partialorder %v120_v56, -50.0 }
  0x6b   :  { %v152_v57 = vsel %vm121_vm7, 1.0, %v209_v7  ;;  %v126_v58 = vsel %vm121_vm7, -65.0, %v120_v56 }
  0x6c   :  { %125 = vst [vmem:[#allocation6 + $0x7] sm:$0x1] %v152_v57  ;;  %127 = vst [vmem:[#allocation2] sm:$0x1] %v126_v58 }
  0x6d   :  { %191 = shalt.err (!%p188_p12)
}
  0x6e   :  { %s192_s28 = scalar_lea.hbm %s269_s2, 128 }
  0x6f   :  { %p193_p13 = scmp.ne.s32.totalorder %s269_s2, %s192_s28  ;;  %p196_p0 = scmp.lt.u32.totalorder %s192_s28, %s269_s2 }
  0x71   :  { %p198_p1 = pnand %p196_p0, %p193_p13 }
  0x73   :  { %201 = shalt.err (!%p198_p1)
}
  0x74   :  { %139 = dma.vmem_to_hbm [thread:$0]  %s134_s1, 128, %s269_s2, [#allocation5], %s207_s19, %s207_s19, %s208_s20  }
  0x75   :  { %204 = dma.done.wait [#allocation5], 128  }
  0x76   :  { %205 = vsyncadd [#allocation5], 4294967168 }
  0x77   :  { %143 = vsyncpa [#allocation4], 1 }
  0x78   :  { %144 = vsyncpa [#allocation5], 1 }

</bundles_post_ra>
